<compile_context>
chip_gen: v6e
topology: v6e:2x2x1
jax: 0.10.0
libtpu: 0.0.40
codegen_flags: <defaults>
</compile_context>

<pallas_src>
import functools

import jax
import jax.numpy as jnp
from jax.experimental import pallas as pl
from jax.experimental.pallas import tpu as pltpu

C_PAD = 128  # lane-dense padded channel width used for all in-kernel matmul operands


# --------------------------------------------------------------------------- kernel

def _fused_forward_kernel(im_ref, mask_ref, w_entry_ref, b_entry_ref, w_dw_ref,
                          w_pw_ref, b_pw_ref, w_sk_ref, b_sk_ref,
                          w_fc_ref, b_fc_ref,
                          feat_ref, cls_ref,
                          ypad_ref,
                          *, Ho, Wp, inv_hw):
    f32 = jnp.float32
    bf16 = jnp.bfloat16
    HoWp = Ho * Wp
    head = Wp + 1                     # flat index of padded pixel (1,1)
    ytot = (Ho + 3) * Wp              # scratch rows (incl. overflow rows for tap slices)

    mask = mask_ref[...]              # (HoWp, 1) f32: 1.0 on real output pixels

    # ---- entry 3x3/s2 conv (+ folded BN + ReLU) as ONE matmul --------------------
    # im2col packs the 27 real (kh,kw,cin) taps on the lane axis; the 9 tap matrices
    # (BN scale folded) are fused into a single (128, C_PAD) bf16 weight.
    y = jnp.dot(im_ref[0], w_entry_ref[...], preferred_element_type=f32)
    y = jnp.maximum(y + b_entry_ref[...], 0.0) * mask          # mask zeroes halo cols

    # ---- flat halo'd buffer: row r = i*Wp + j (1-px zero border baked in) --------
    ypad_ref[0:head, :] = jnp.zeros((head, C_PAD), f32)                      # top halo
    ypad_ref[head + HoWp:ytot, :] = jnp.zeros((ytot - head - HoWp, C_PAD), f32)  # bottom
    ypad_ref[head:head + HoWp, :] = y                          # ONE contiguous store

    # ---- depthwise 3x3 (pad=1): in the flat layout every tap is one contiguous ----
    # (HoWp, 128) slice at offset kh*Wp+kw -> 9 VPU FMAs, no reshapes, no row loop.
    dw = ypad_ref[0:HoWp, :] * w_dw_ref[0:1, :]
    for k in range(1, 9):
        off = (k // 3) * Wp + (k % 3)
        dw = dw + ypad_ref[off:off + HoWp, :] * w_dw_ref[k:k + 1, :]

    # ---- pointwise 1x1 + skip 1x1 (BN folded) over the WHOLE map: two big matmuls -
    main = jnp.dot(dw.astype(bf16), w_pw_ref[...],
                   preferred_element_type=f32) + b_pw_ref[...]
    skip = jnp.dot(ypad_ref[head:head + HoWp, :].astype(bf16), w_sk_ref[...],
                   preferred_element_type=f32) + b_sk_ref[...]
    feat = main + skip                                         # (HoWp, C_PAD)
    feat_ref[0] = feat                # lane-dense full-tile store (halo cols sliced off
                                      # in the wrapper)

    # ---- classifier: ReLU -> masked global-avg-pool -> Linear (softmax in wrapper) -
    pooled = jnp.sum(jnp.maximum(feat, 0.0) * mask, axis=0, keepdims=True) * inv_hw
    cls_ref[0] = jnp.dot(pooled, w_fc_ref[...],
                         preferred_element_type=f32) + b_fc_ref[...]


# --------------------------------------------------------------------------- glue

def _fold_bn(gamma, beta, mean, var, eps=1e-5):
    # Eval-mode BatchNorm as per-channel affine (scale folded into weights, shift kept).
    scale = gamma / jnp.sqrt(var + eps)
    shift = beta - mean * scale
    return scale, shift


def _bn_params(key, c):
    k1, k2, k3, k4 = jax.random.split(key, 4)
    gamma = 1.0 + 0.1 * jax.random.normal(k1, (c,), jnp.float32)
    beta = 0.1 * jax.random.normal(k2, (c,), jnp.float32)
    mean = 0.1 * jax.random.normal(k3, (c,), jnp.float32)
    var = 1.0 + 0.1 * jax.random.uniform(k4, (c,), jnp.float32)
    return gamma, beta, mean, var


def init_params(key, c_in=3, c1=8, c2=16, num_classes=2):
    ks = jax.random.split(key, 9)
    p = {}
    p['conv1_w'] = 0.2 * jax.random.normal(ks[0], (c1, c_in, 3, 3), jnp.float32)  # torch (Cout,Cin,kh,kw)
    p['bn1'] = _bn_params(ks[1], c1)
    p['dw_w'] = 0.2 * jax.random.normal(ks[2], (c1, 1, 3, 3), jnp.float32)        # depthwise (C,1,3,3)
    p['pw_w'] = 0.2 * jax.random.normal(ks[3], (c2, c1, 1, 1), jnp.float32)       # pointwise 1x1
    p['bn2'] = _bn_params(ks[4], c2)
    p['skip_w'] = 0.2 * jax.random.normal(ks[5], (c2, c1, 1, 1), jnp.float32)     # residual 1x1
    p['bn_skip'] = _bn_params(ks[6], c2)
    p['fc_w'] = 0.2 * jax.random.normal(ks[7], (num_classes, c2), jnp.float32)    # torch (out,in)
    p['fc_b'] = 0.1 * jax.random.normal(ks[8], (num_classes,), jnp.float32)
    return p


def xception_detector_forward(params, x_nchw):
    c1, c_in = params['conv1_w'].shape[0], params['conv1_w'].shape[1]
    c2 = params['pw_w'].shape[0]
    num_classes = params['fc_w'].shape[0]
    N, _, H, W = x_nchw.shape
    Ho = (H - 3) // 2 + 1
    Wo = (W - 3) // 2 + 1
    Wp = Wo + 2                        # padded-width flat layout (matches depthwise halo)
    HoWp = Ho * Wp
    n_taps = 9 * c_in

    # ---- entry-conv im2col: 27 real taps packed on the lane axis, halo cols zero ---
    x = jnp.transpose(x_nchw, (0, 2, 3, 1)).astype(jnp.float32)            # NHWC
    patches = [x[:, kh:kh + 2 * Ho:2, kw:kw + 2 * Wo:2, :]
               for kh in range(3) for kw in range(3)]
    im2col = jnp.concatenate(patches, axis=-1)                              # (N,Ho,Wo,27)
    im2col = jnp.pad(im2col, ((0, 0), (0, 0), (0, Wp - Wo), (0, C_PAD - n_taps)))
    im2col = im2col.reshape(N, HoWp, C_PAD).astype(jnp.bfloat16)            # (N,Ho*Wp,128)

    # interior mask over flat rows (1.0 where the row is a real output pixel)
    mask = (jnp.arange(HoWp) % Wp < Wo).astype(jnp.float32).reshape(HoWp, 1)

    # ---- weights: fold BN scale, pad to 128 lanes, bf16 MXU operands ---------------
    s1, b1 = _fold_bn(*params['bn1'])
    w_entry = (jnp.transpose(params['conv1_w'], (2, 3, 1, 0)) * s1).reshape(n_taps, c1)
    w_entry = jnp.pad(w_entry, ((0, C_PAD - n_taps), (0, C_PAD - c1))).astype(jnp.bfloat16)
    b_entry = jnp.pad(b1, (0, C_PAD - c1)).reshape(1, C_PAD).astype(jnp.float32)

    w_dw = jnp.transpose(params['dw_w'][:, 0], (1, 2, 0)).reshape(9, c1)            # (9,C1)
    w_dw = jnp.pad(w_dw, ((0, 0), (0, C_PAD - c1))).astype(jnp.float32)

    s2, b2 = _fold_bn(*params['bn2'])
    w_pw = jnp.transpose(params['pw_w'][:, :, 0, 0], (1, 0)) * s2                   # (C1,C2)
    w_pw = jnp.pad(w_pw, ((0, C_PAD - c1), (0, C_PAD - c2))).astype(jnp.bfloat16)
    b_pw = jnp.pad(b2, (0, C_PAD - c2)).reshape(1, C_PAD).astype(jnp.float32)

    ss, sb = _fold_bn(*params['bn_skip'])
    w_sk = jnp.transpose(params['skip_w'][:, :, 0, 0], (1, 0)) * ss
    w_sk = jnp.pad(w_sk, ((0, C_PAD - c1), (0, C_PAD - c2))).astype(jnp.bfloat16)
    b_sk = jnp.pad(sb, (0, C_PAD - c2)).reshape(1, C_PAD).astype(jnp.float32)

    w_fc = jnp.pad(jnp.transpose(params['fc_w']),
                   ((0, C_PAD - c2), (0, C_PAD - num_classes))).astype(jnp.float32)
    b_fc = jnp.pad(params['fc_b'], (0, C_PAD - num_classes)).reshape(1, C_PAD).astype(jnp.float32)

    kernel = functools.partial(_fused_forward_kernel, Ho=Ho, Wp=Wp,
                               inv_hw=1.0 / float(Ho * Wo))

    feat_pad, cls_pad = pl.pallas_call(
        kernel,
        out_shape=(
            jax.ShapeDtypeStruct((N, HoWp, C_PAD), jnp.float32),
            jax.ShapeDtypeStruct((N, 1, C_PAD), jnp.float32),
        ),
        grid=(N,),
        in_specs=[
            pl.BlockSpec((1, HoWp, C_PAD), lambda b: (b, 0, 0)),   # im2col (per image)
            pl.BlockSpec((HoWp, 1), lambda b: (0, 0)),             # interior-row mask
            pl.BlockSpec((C_PAD, C_PAD), lambda b: (0, 0)),        # fused entry-conv weight
            pl.BlockSpec((1, C_PAD), lambda b: (0, 0)),            # entry BN shift
            pl.BlockSpec((9, C_PAD), lambda b: (0, 0)),            # depthwise taps
            pl.BlockSpec((C_PAD, C_PAD), lambda b: (0, 0)),        # pointwise (BN folded)
            pl.BlockSpec((1, C_PAD), lambda b: (0, 0)),            # pointwise BN shift
            pl.BlockSpec((C_PAD, C_PAD), lambda b: (0, 0)),        # skip 1x1 (BN folded)
            pl.BlockSpec((1, C_PAD), lambda b: (0, 0)),            # skip BN shift
            pl.BlockSpec((C_PAD, C_PAD), lambda b: (0, 0)),        # fc weight (lane-padded)
            pl.BlockSpec((1, C_PAD), lambda b: (0, 0)),            # fc bias (lane-padded)
        ],
        out_specs=(
            pl.BlockSpec((1, HoWp, C_PAD), lambda b: (b, 0, 0)),   # feat (flat, padded)
            pl.BlockSpec((1, 1, C_PAD), lambda b: (b, 0, 0)),      # logits (lane-padded)
        ),
        scratch_shapes=[pltpu.VMEM(((Ho + 3) * Wp, C_PAD), jnp.float32)],  # flat halo'd y
        compiler_params=pltpu.CompilerParams(dimension_semantics=("parallel",)),
    )(im2col, mask, w_entry, b_entry, w_dw, w_pw, b_pw, w_sk, b_sk, w_fc, b_fc)

    feat = feat_pad.reshape(N, Ho, Wp, C_PAD)[:, :, :Wo, :c2]
    feat_nchw = jnp.transpose(feat, (0, 3, 1, 2))                  # back to torch NCHW
    cls = cls_pad[:, 0, :num_classes]
    prob = jax.nn.softmax(cls, axis=1)[:, 1]                       # softmax moved out of kernel
    return {'cls': cls, 'prob': prob, 'feat': feat_nchw}


# ---------------------------------------------------------------- pure-JAX reference

def reference_forward(params, x_nchw):
    dn = ('NCHW', 'OIHW', 'NCHW')
    s1, b1 = _fold_bn(*params['bn1'])
    y = jax.lax.conv_general_dilated(x_nchw, params['conv1_w'], (2, 2), 'VALID',
                                     dimension_numbers=dn)
    y = jnp.maximum(y * s1[None, :, None, None] + b1[None, :, None, None], 0.0)
    c1 = y.shape[1]
    dw = jax.lax.conv_general_dilated(y, params['dw_w'], (1, 1), ((1, 1), (1, 1)),
                                      dimension_numbers=dn, feature_group_count=c1)
    s2, b2 = _fold_bn(*params['bn2'])
    main = jax.lax.conv_general_dilated(dw, params['pw_w'], (1, 1), 'VALID',
                                        dimension_numbers=dn)
    main = main * s2[None, :, None, None] + b2[None, :, None, None]
    ss, sb = _fold_bn(*params['bn_skip'])
    skip = jax.lax.conv_general_dilated(y, params['skip_w'], (1, 1), 'VALID',
                                        dimension_numbers=dn)
    skip = skip * ss[None, :, None, None] + sb[None, :, None, None]
    feat = main + skip
    pooled = jnp.mean(jnp.maximum(feat, 0.0), axis=(2, 3))
    cls = pooled @ params['fc_w'].T + params['fc_b']
    prob = jax.nn.softmax(cls, axis=1)[:, 1]
    return {'cls': cls, 'prob': prob, 'feat': feat}

# TODO(synk): build_backbone/build_loss dynamic checkpoint loading and get_losses are
# not part of forward() and are replaced by the in-script deterministic backbone.


if __name__ == "__main__":
    key = jax.random.PRNGKey(0)
    k_param, k_input = jax.random.split(key)
    params = init_params(k_param)
    x = jax.random.normal(k_input, (2, 3, 16, 16), jnp.float32)             # NCHW, like torch

    out = jax.jit(xception_detector_forward)(params, x)
    jax.block_until_ready(out)

    assert out['cls'].shape == (2, 2)
    assert out['prob'].shape == (2,)
    assert out['feat'].shape == (2, 16, 7, 7)

    # numerical check against a pure-JAX f32 reference (kernel matmuls are bf16)
    ref = reference_forward(params, x)
    assert jnp.allclose(out['feat'], ref['feat'], atol=5e-2, rtol=5e-2)
    assert jnp.allclose(out['cls'], ref['cls'], atol=5e-2, rtol=5e-2)
    assert jnp.allclose(out['prob'], ref['prob'], atol=5e-2, rtol=5e-2)
    # softmax sanity: prob must be softmax(cls)[:, 1]
    assert jnp.allclose(out['prob'], jax.nn.softmax(out['cls'], axis=1)[:, 1], atol=1e-6)

    print("KERNEL_OK")
</pallas_src>

<mosaic_0001>
module attributes {stable_mosaic.version = 11 : i64} {
  func.func @_fused_forward_kernel(%arg0: i32, %arg1: memref<1x63x128xbf16, #tpu.memory_space<vmem>>, %arg2: memref<63x1xf32, #tpu.memory_space<vmem>>, %arg3: memref<128x128xbf16, #tpu.memory_space<vmem>>, %arg4: memref<1x128xf32, #tpu.memory_space<vmem>>, %arg5: memref<9x128xf32, #tpu.memory_space<vmem>>, %arg6: memref<128x128xbf16, #tpu.memory_space<vmem>>, %arg7: memref<1x128xf32, #tpu.memory_space<vmem>>, %arg8: memref<128x128xbf16, #tpu.memory_space<vmem>>, %arg9: memref<1x128xf32, #tpu.memory_space<vmem>>, %arg10: memref<128x128xf32, #tpu.memory_space<vmem>>, %arg11: memref<1x128xf32, #tpu.memory_space<vmem>>, %arg12: memref<1x63x128xf32, #tpu.memory_space<vmem>>, %arg13: memref<1x1x128xf32, #tpu.memory_space<vmem>>, %arg14: memref<90x128xf32, #tpu.memory_space<vmem>>) attributes {dimension_semantics = [#tpu.dimension_semantics<parallel>], iteration_bounds = array<i64: 2>, scalar_prefetch = 0 : i64, scratch_operands = 1 : i64, tpu.core_type = #tpu.core_type<tc>, window_params = [{transform_indices = @transform_0, window_bounds = array<i64: 1, 63, 128>}, {pipeline_mode = #tpu.pipeline_mode<synchronous>, transform_indices = @transform_1, window_bounds = array<i64: 63, 1>}, {pipeline_mode = #tpu.pipeline_mode<synchronous>, transform_indices = @transform_2, window_bounds = array<i64: 128, 128>}, {pipeline_mode = #tpu.pipeline_mode<synchronous>, transform_indices = @transform_3, window_bounds = array<i64: 1, 128>}, {pipeline_mode = #tpu.pipeline_mode<synchronous>, transform_indices = @transform_4, window_bounds = array<i64: 9, 128>}, {pipeline_mode = #tpu.pipeline_mode<synchronous>, transform_indices = @transform_5, window_bounds = array<i64: 128, 128>}, {pipeline_mode = #tpu.pipeline_mode<synchronous>, transform_indices = @transform_6, window_bounds = array<i64: 1, 128>}, {pipeline_mode = #tpu.pipeline_mode<synchronous>, transform_indices = @transform_7, window_bounds = array<i64: 128, 128>}, {pipeline_mode = #tpu.pipeline_mode<synchronous>, transform_indices = @transform_8, window_bounds = array<i64: 1, 128>}, {pipeline_mode = #tpu.pipeline_mode<synchronous>, transform_indices = @transform_9, window_bounds = array<i64: 128, 128>}, {pipeline_mode = #tpu.pipeline_mode<synchronous>, transform_indices = @transform_10, window_bounds = array<i64: 1, 128>}, {transform_indices = @transform_11, window_bounds = array<i64: 1, 63, 128>}, {transform_indices = @transform_12, window_bounds = array<i64: 1, 1, 128>}]} {
    %c0 = arith.constant 0 : index
    %c0_0 = arith.constant 0 : index
    %0 = vector.load %arg2[%c0, %c0_0] : memref<63x1xf32, #tpu.memory_space<vmem>>, vector<63x1xf32>
    %c0_1 = arith.constant 0 : index
    %c0_2 = arith.constant 0 : index
    %c0_3 = arith.constant 0 : index
    %1 = vector.load %arg1[%c0_1, %c0_2, %c0_3] : memref<1x63x128xbf16, #tpu.memory_space<vmem>>, vector<1x63x128xbf16>
    %2 = vector.shape_cast %1 : vector<1x63x128xbf16> to vector<63x128xbf16>
    %c0_4 = arith.constant 0 : index
    %c0_5 = arith.constant 0 : index
    %3 = vector.load %arg3[%c0_4, %c0_5] : memref<128x128xbf16, #tpu.memory_space<vmem>>, vector<128x128xbf16>
    %cst = arith.constant dense<0.000000e+00> : vector<63x128xf32>
    %4 = tpu.matmul %2, %3, %cst {dimension_numbers = #tpu.dot_dimension_numbers<[1], [0], [0], [1], [0, 0, 1, 1], [], []>} : vector<63x128xbf16>, vector<128x128xbf16>, vector<63x128xf32> -> vector<63x128xf32>
    %c0_6 = arith.constant 0 : index
    %c0_7 = arith.constant 0 : index
    %5 = vector.load %arg4[%c0_6, %c0_7] : memref<1x128xf32, #tpu.memory_space<vmem>>, vector<1x128xf32>
    %6 = vector.broadcast %5 : vector<1x128xf32> to vector<63x128xf32>
    %7 = arith.addf %4, %6 : vector<63x128xf32>
    %cst_8 = arith.constant 0.000000e+00 : f32
    %8 = vector.broadcast %cst_8 : f32 to vector<63x128xf32>
    %9 = arith.maximumf %7, %8 : vector<63x128xf32>
    %10 = vector.broadcast %0 : vector<63x1xf32> to vector<63x128xf32>
    %11 = arith.mulf %9, %10 : vector<63x128xf32>
    %cst_9 = arith.constant 0.000000e+00 : f32
    %12 = vector.broadcast %cst_9 : f32 to vector<10x128xf32>
    %c0_10 = arith.constant 0 : index
    %c0_11 = arith.constant 0 : index
    %13 = vector.load %arg14[%c0_10, %c0_11] : memref<90x128xf32, #tpu.memory_space<vmem>>, vector<10x128xf32>
    tpu.vector_store %arg14[%c0_10, %c0_11], %12 {strides = array<i32>} : memref<90x128xf32, #tpu.memory_space<vmem>>, vector<10x128xf32>,
    %cst_12 = arith.constant 0.000000e+00 : f32
    %14 = vector.broadcast %cst_12 : f32 to vector<17x128xf32>
    %c73 = arith.constant 73 : index
    %c0_13 = arith.constant 0 : index
    %15 = vector.load %arg14[%c73, %c0_13] : memref<90x128xf32, #tpu.memory_space<vmem>>, vector<17x128xf32>
    tpu.vector_store %arg14[%c73, %c0_13], %14 {strides = array<i32>} : memref<90x128xf32, #tpu.memory_space<vmem>>, vector<17x128xf32>,
    %c10 = arith.constant 10 : index
    %c0_14 = arith.constant 0 : index
    %16 = vector.load %arg14[%c10, %c0_14] : memref<90x128xf32, #tpu.memory_space<vmem>>, vector<63x128xf32>
    tpu.vector_store %arg14[%c10, %c0_14], %11 {strides = array<i32>} : memref<90x128xf32, #tpu.memory_space<vmem>>, vector<63x128xf32>,
    %c0_15 = arith.constant 0 : index
    %c0_16 = arith.constant 0 : index
    %17 = vector.load %arg14[%c0_15, %c0_16] : memref<90x128xf32, #tpu.memory_space<vmem>>, vector<63x128xf32>
    %c0_17 = arith.constant 0 : index
    %c0_18 = arith.constant 0 : index
    %18 = vector.load %arg5[%c0_17, %c0_18] : memref<9x128xf32, #tpu.memory_space<vmem>>, vector<1x128xf32>
    %19 = vector.broadcast %18 : vector<1x128xf32> to vector<63x128xf32>
    %20 = arith.mulf %17, %19 : vector<63x128xf32>
    %c1 = arith.constant 1 : index
    %c0_19 = arith.constant 0 : index
    %21 = vector.load %arg14[%c1, %c0_19] : memref<90x128xf32, #tpu.memory_space<vmem>>, vector<63x128xf32>
    %c1_20 = arith.constant 1 : index
    %c0_21 = arith.constant 0 : index
    %22 = vector.load %arg5[%c1_20, %c0_21] : memref<9x128xf32, #tpu.memory_space<vmem>>, vector<1x128xf32>
    %23 = vector.broadcast %22 : vector<1x128xf32> to vector<63x128xf32>
    %24 = arith.mulf %21, %23 : vector<63x128xf32>
    %25 = arith.addf %20, %24 : vector<63x128xf32>
    %c2 = arith.constant 2 : index
    %c0_22 = arith.constant 0 : index
    %26 = vector.load %arg14[%c2, %c0_22] : memref<90x128xf32, #tpu.memory_space<vmem>>, vector<63x128xf32>
    %c2_23 = arith.constant 2 : index
    %c0_24 = arith.constant 0 : index
    %27 = vector.load %arg5[%c2_23, %c0_24] : memref<9x128xf32, #tpu.memory_space<vmem>>, vector<1x128xf32>
    %28 = vector.broadcast %27 : vector<1x128xf32> to vector<63x128xf32>
    %29 = arith.mulf %26, %28 : vector<63x128xf32>
    %30 = arith.addf %25, %29 : vector<63x128xf32>
    %c9 = arith.constant 9 : index
    %c0_25 = arith.constant 0 : index
    %31 = vector.load %arg14[%c9, %c0_25] : memref<90x128xf32, #tpu.memory_space<vmem>>, vector<63x128xf32>
    %c3 = arith.constant 3 : index
    %c0_26 = arith.constant 0 : index
    %32 = vector.load %arg5[%c3, %c0_26] : memref<9x128xf32, #tpu.memory_space<vmem>>, vector<1x128xf32>
    %33 = vector.broadcast %32 : vector<1x128xf32> to vector<63x128xf32>
    %34 = arith.mulf %31, %33 : vector<63x128xf32>
    %35 = arith.addf %30, %34 : vector<63x128xf32>
    %c10_27 = arith.constant 10 : index
    %c0_28 = arith.constant 0 : index
    %36 = vector.load %arg14[%c10_27, %c0_28] : memref<90x128xf32, #tpu.memory_space<vmem>>, vector<63x128xf32>
    %c4 = arith.constant 4 : index
    %c0_29 = arith.constant 0 : index
    %37 = vector.load %arg5[%c4, %c0_29] : memref<9x128xf32, #tpu.memory_space<vmem>>, vector<1x128xf32>
    %38 = vector.broadcast %37 : vector<1x128xf32> to vector<63x128xf32>
    %39 = arith.mulf %36, %38 : vector<63x128xf32>
    %40 = arith.addf %35, %39 : vector<63x128xf32>
    %c11 = arith.constant 11 : index
    %c0_30 = arith.constant 0 : index
    %41 = vector.load %arg14[%c11, %c0_30] : memref<90x128xf32, #tpu.memory_space<vmem>>, vector<63x128xf32>
    %c5 = arith.constant 5 : index
    %c0_31 = arith.constant 0 : index
    %42 = vector.load %arg5[%c5, %c0_31] : memref<9x128xf32, #tpu.memory_space<vmem>>, vector<1x128xf32>
    %43 = vector.broadcast %42 : vector<1x128xf32> to vector<63x128xf32>
    %44 = arith.mulf %41, %43 : vector<63x128xf32>
    %45 = arith.addf %40, %44 : vector<63x128xf32>
    %c18 = arith.constant 18 : index
    %c0_32 = arith.constant 0 : index
    %46 = vector.load %arg14[%c18, %c0_32] : memref<90x128xf32, #tpu.memory_space<vmem>>, vector<63x128xf32>
    %c6 = arith.constant 6 : index
    %c0_33 = arith.constant 0 : index
    %47 = vector.load %arg5[%c6, %c0_33] : memref<9x128xf32, #tpu.memory_space<vmem>>, vector<1x128xf32>
    %48 = vector.broadcast %47 : vector<1x128xf32> to vector<63x128xf32>
    %49 = arith.mulf %46, %48 : vector<63x128xf32>
    %50 = arith.addf %45, %49 : vector<63x128xf32>
    %c19 = arith.constant 19 : index
    %c0_34 = arith.constant 0 : index
    %51 = vector.load %arg14[%c19, %c0_34] : memref<90x128xf32, #tpu.memory_space<vmem>>, vector<63x128xf32>
    %c7 = arith.constant 7 : index
    %c0_35 = arith.constant 0 : index
    %52 = vector.load %arg5[%c7, %c0_35] : memref<9x128xf32, #tpu.memory_space<vmem>>, vector<1x128xf32>
    %53 = vector.broadcast %52 : vector<1x128xf32> to vector<63x128xf32>
    %54 = arith.mulf %51, %53 : vector<63x128xf32>
    %55 = arith.addf %50, %54 : vector<63x128xf32>
    %c20 = arith.constant 20 : index
    %c0_36 = arith.constant 0 : index
    %56 = vector.load %arg14[%c20, %c0_36] : memref<90x128xf32, #tpu.memory_space<vmem>>, vector<63x128xf32>
    %c8 = arith.constant 8 : index
    %c0_37 = arith.constant 0 : index
    %57 = vector.load %arg5[%c8, %c0_37] : memref<9x128xf32, #tpu.memory_space<vmem>>, vector<1x128xf32>
    %58 = vector.broadcast %57 : vector<1x128xf32> to vector<63x128xf32>
    %59 = arith.mulf %56, %58 : vector<63x128xf32>
    %60 = arith.addf %55, %59 : vector<63x128xf32>
    %61 = arith.truncf %60 : vector<63x128xf32> to vector<63x128xbf16>
    %c0_38 = arith.constant 0 : index
    %c0_39 = arith.constant 0 : index
    %62 = vector.load %arg6[%c0_38, %c0_39] : memref<128x128xbf16, #tpu.memory_space<vmem>>, vector<128x128xbf16>
    %cst_40 = arith.constant dense<0.000000e+00> : vector<63x128xf32>
    %63 = tpu.matmul %61, %62, %cst_40 {dimension_numbers = #tpu.dot_dimension_numbers<[1], [0], [0], [1], [0, 0, 1, 1], [], []>} : vector<63x128xbf16>, vector<128x128xbf16>, vector<63x128xf32> -> vector<63x128xf32>
    %c0_41 = arith.constant 0 : index
    %c0_42 = arith.constant 0 : index
    %64 = vector.load %arg7[%c0_41, %c0_42] : memref<1x128xf32, #tpu.memory_space<vmem>>, vector<1x128xf32>
    %65 = vector.broadcast %64 : vector<1x128xf32> to vector<63x128xf32>
    %66 = arith.addf %63, %65 : vector<63x128xf32>
    %c10_43 = arith.constant 10 : index
    %c0_44 = arith.constant 0 : index
    %67 = vector.load %arg14[%c10_43, %c0_44] : memref<90x128xf32, #tpu.memory_space<vmem>>, vector<63x128xf32>
    %68 = arith.truncf %67 : vector<63x128xf32> to vector<63x128xbf16>
    %c0_45 = arith.constant 0 : index
    %c0_46 = arith.constant 0 : index
    %69 = vector.load %arg8[%c0_45, %c0_46] : memref<128x128xbf16, #tpu.memory_space<vmem>>, vector<128x128xbf16>
    %cst_47 = arith.constant dense<0.000000e+00> : vector<63x128xf32>
    %70 = tpu.matmul %68, %69, %cst_47 {dimension_numbers = #tpu.dot_dimension_numbers<[1], [0], [0], [1], [0, 0, 1, 1], [], []>} : vector<63x128xbf16>, vector<128x128xbf16>, vector<63x128xf32> -> vector<63x128xf32>
    %c0_48 = arith.constant 0 : index
    %c0_49 = arith.constant 0 : index
    %71 = vector.load %arg9[%c0_48, %c0_49] : memref<1x128xf32, #tpu.memory_space<vmem>>, vector<1x128xf32>
    %72 = vector.broadcast %71 : vector<1x128xf32> to vector<63x128xf32>
    %73 = arith.addf %70, %72 : vector<63x128xf32>
    %74 = arith.addf %66, %73 : vector<63x128xf32>
    %c0_50 = arith.constant 0 : index
    %c0_51 = arith.constant 0 : index
    %c0_52 = arith.constant 0 : index
    %75 = vector.load %arg12[%c0_50, %c0_51, %c0_52] : memref<1x63x128xf32, #tpu.memory_space<vmem>>, vector<1x63x128xf32>
    %76 = vector.shape_cast %75 : vector<1x63x128xf32> to vector<63x128xf32>
    %77 = vector.shape_cast %74 : vector<63x128xf32> to vector<1x63x128xf32>
    tpu.vector_store %arg12[%c0_50, %c0_51, %c0_52], %77 {strides = array<i32>} : memref<1x63x128xf32, #tpu.memory_space<vmem>>, vector<1x63x128xf32>,
    %cst_53 = arith.constant 0.000000e+00 : f32
    %78 = vector.broadcast %cst_53 : f32 to vector<63x128xf32>
    %79 = arith.maximumf %74, %78 : vector<63x128xf32>
    %80 = vector.broadcast %0 : vector<63x1xf32> to vector<63x128xf32>
    %81 = arith.mulf %79, %80 : vector<63x128xf32>
    %cst_54 = arith.constant dense<0.000000e+00> : vector<128xf32>
    %82 = vector.multi_reduction <add>, %81, %cst_54 [0] : vector<63x128xf32> to vector<128xf32>
    %83 = vector.shape_cast %82 : vector<128xf32> to vector<1x128xf32>
    %cst_55 = arith.constant 0.0204081628 : f32
    %84 = vector.broadcast %cst_55 : f32 to vector<1x128xf32>
    %85 = arith.mulf %83, %84 : vector<1x128xf32>
    %c0_56 = arith.constant 0 : index
    %c0_57 = arith.constant 0 : index
    %86 = vector.load %arg10[%c0_56, %c0_57] : memref<128x128xf32, #tpu.memory_space<vmem>>, vector<128x128xf32>
    %cst_58 = arith.constant dense<0.000000e+00> : vector<1x128xf32>
    %87 = tpu.matmul %85, %86, %cst_58 {dimension_numbers = #tpu.dot_dimension_numbers<[1], [0], [0], [1], [0, 0, 1, 1], [], []>} : vector<1x128xf32>, vector<128x128xf32>, vector<1x128xf32> -> vector<1x128xf32>
    %c0_59 = arith.constant 0 : index
    %c0_60 = arith.constant 0 : index
    %88 = vector.load %arg11[%c0_59, %c0_60] : memref<1x128xf32, #tpu.memory_space<vmem>>, vector<1x128xf32>
    %89 = arith.addf %87, %88 : vector<1x128xf32>
    %c0_61 = arith.constant 0 : index
    %c0_62 = arith.constant 0 : index
    %c0_63 = arith.constant 0 : index
    %90 = vector.load %arg13[%c0_61, %c0_62, %c0_63] : memref<1x1x128xf32, #tpu.memory_space<vmem>>, vector<1x1x128xf32>
    %91 = vector.shape_cast %90 : vector<1x1x128xf32> to vector<1x128xf32>
    %92 = vector.shape_cast %89 : vector<1x128xf32> to vector<1x1x128xf32>
    tpu.vector_store %arg13[%c0_61, %c0_62, %c0_63], %92 {strides = array<i32>} : memref<1x1x128xf32, #tpu.memory_space<vmem>>, vector<1x1x128xf32>,
    return
  }
  func.func @transform_0(%arg0: i32) -> (i32, i32, i32) {
    %c0_i32 = arith.constant 0 : i32
    %c0_i32_0 = arith.constant 0 : i32
    %c0_i32_1 = arith.constant 0 : i32
    return %arg0, %c0_i32, %c0_i32_0 : i32, i32, i32
  }
  func.func @transform_1(%arg0: i32) -> (i32, i32) {
    %c0_i32 = arith.constant 0 : i32
    %c0_i32_0 = arith.constant 0 : i32
    %c0_i32_1 = arith.constant 0 : i32
    return %c0_i32, %c0_i32_0 : i32, i32
  }
  func.func @transform_2(%arg0: i32) -> (i32, i32) {
    %c0_i32 = arith.constant 0 : i32
    %c0_i32_0 = arith.constant 0 : i32
    %c0_i32_1 = arith.constant 0 : i32
    return %c0_i32, %c0_i32_0 : i32, i32
  }
  func.func @transform_3(%arg0: i32) -> (i32, i32) {
    %c0_i32 = arith.constant 0 : i32
    %c0_i32_0 = arith.constant 0 : i32
    %c0_i32_1 = arith.constant 0 : i32
    return %c0_i32, %c0_i32_0 : i32, i32
  }
  func.func @transform_4(%arg0: i32) -> (i32, i32) {
    %c0_i32 = arith.constant 0 : i32
    %c0_i32_0 = arith.constant 0 : i32
    %c0_i32_1 = arith.constant 0 : i32
    return %c0_i32, %c0_i32_0 : i32, i32
  }
  func.func @transform_5(%arg0: i32) -> (i32, i32) {
    %c0_i32 = arith.constant 0 : i32
    %c0_i32_0 = arith.constant 0 : i32
    %c0_i32_1 = arith.constant 0 : i32
    return %c0_i32, %c0_i32_0 : i32, i32
  }
  func.func @transform_6(%arg0: i32) -> (i32, i32) {
    %c0_i32 = arith.constant 0 : i32
    %c0_i32_0 = arith.constant 0 : i32
    %c0_i32_1 = arith.constant 0 : i32
    return %c0_i32, %c0_i32_0 : i32, i32
  }
  func.func @transform_7(%arg0: i32) -> (i32, i32) {
    %c0_i32 = arith.constant 0 : i32
    %c0_i32_0 = arith.constant 0 : i32
    %c0_i32_1 = arith.constant 0 : i32
    return %c0_i32, %c0_i32_0 : i32, i32
  }
  func.func @transform_8(%arg0: i32) -> (i32, i32) {
    %c0_i32 = arith.constant 0 : i32
    %c0_i32_0 = arith.constant 0 : i32
    %c0_i32_1 = arith.constant 0 : i32
    return %c0_i32, %c0_i32_0 : i32, i32
  }
  func.func @transform_9(%arg0: i32) -> (i32, i32) {
    %c0_i32 = arith.constant 0 : i32
    %c0_i32_0 = arith.constant 0 : i32
    %c0_i32_1 = arith.constant 0 : i32
    return %c0_i32, %c0_i32_0 : i32, i32
  }
  func.func @transform_10(%arg0: i32) -> (i32, i32) {
    %c0_i32 = arith.constant 0 : i32
    %c0_i32_0 = arith.constant 0 : i32
    %c0_i32_1 = arith.constant 0 : i32
    return %c0_i32, %c0_i32_0 : i32, i32
  }
  func.func @transform_11(%arg0: i32) -> (i32, i32, i32) {
    %c0_i32 = arith.constant 0 : i32
    %c0_i32_0 = arith.constant 0 : i32
    %c0_i32_1 = arith.constant 0 : i32
    return %arg0, %c0_i32, %c0_i32_0 : i32, i32, i32
  }
  func.func @transform_12(%arg0: i32) -> (i32, i32, i32) {
    %c0_i32 = arith.constant 0 : i32
    %c0_i32_0 = arith.constant 0 : i32
    %c0_i32_1 = arith.constant 0 : i32
    return %arg0, %c0_i32, %c0_i32_0 : i32, i32, i32
  }
}

</mosaic_0001>

<bundles_post_ra>
// kernel: xception_detector_forward.1
= control target key start
LH: loop header
LB: loop body
LE: loop exit
PB: predicated region body
PF: predicated region fallthrough
CT: control target
= control target key end

     0   :  { %s1724_s21 = smov 0   ;;  %s2163_s0 = inlined_call_operand.vmem [shape: bf16[2,63,128], index: 0, kind: input, shape index: {}]   ;;  %s2164_s1 = inlined_call_operand.vmem [shape: f32[63,1], index: 1, kind: input, shape index: {}]   ;;  %s2165_s2 = inlined_call_operand.vmem [shape: bf16[128,128], index: 2, kind: input, shape index: {}]   ;;  %s2166_s3 = inlined_call_operand.vmem [shape: f32[1,128], index: 3, kind: input, shape index: {}]   ;;  %s2167_s4 = inlined_call_operand.vmem [shape: f32[9,128], index: 4, kind: input, shape index: {}]   ;;  %s2168_s5 = inlined_call_operand.vmem [shape: bf16[128,128], index: 5, kind: input, shape index: {}]   ;;  %s2169_s6 = inlined_call_operand.vmem [shape: f32[1,128], index: 6, kind: input, shape index: {}]   ;;  %s2170_s7 = inlined_call_operand.vmem [shape: bf16[128,128], index: 7, kind: input, shape index: {}]   ;;  %s2171_s8 = inlined_call_operand.vmem [shape: f32[1,128], index: 8, kind: input, shape index: {}]   ;;  %s2172_s9 = inlined_call_operand.vmem [shape: f32[128,128], index: 9, kind: input, shape index: {}]   ;;  %s2173_s10 = inlined_call_operand.vmem [shape: f32[1,128], index: 10, kind: input, shape index: {}]   ;;  %s2174_s11 = inlined_call_operand.vmem [shape: f32[2,63,128], index: 11, kind: output, shape index: {0}]   ;;  %s2175_s12 = inlined_call_operand.vmem [shape: f32[2,1,128], index: 12, kind: output, shape index: {1}]  }
   0x1 LB: > { %s1394_s22 = sadd.s32 4294967295, %s1654_s21   ;;  %p1398_p0 = scmp.ge.s32.totalorder %s1654_s21, 1  ;;  %s1654_s21 = sphi %s1724_s21, %s23_s21  }
   0x2   : > { %p365_p1 = scmp.lt.s32.totalorder %s1654_s21, 3 }
   0x4   : > { %p366_p2 = pnand %p1398_p0, %p365_p1 }
   0x6   : > { %369 = sbr.rel (%p366_p2) target bundleno = 715 (0x2cb), region = 64 }
   0xb   : > { %v1620_v0 = vld [vmem:[%s2165_s2 + $0x38] sm:$0xff]   ;;  %p410_p3 = scmp.lt.s32.totalorder %s1394_s22, 1  ;;  %v1621_v1 = vld [vmem:[%s2165_s2 + $0x30] sm:$0xff]   ;;  %v1656_v2 = vmov 0   ;;  %v1622_v3 = vld [vmem:[%s2165_s2 + $0x28] sm:$0xff]   ;;  %v2176_v27 = vmov 0.0  }
   0xc   : > { %1500 = vmatprep.subr.bf16.mxu0 %v1620_v0  ;;  %1618 = vset.pattern.permute.xlu0 %v1656_v2  ;;  %v1623_v4 = vld [vmem:[%s2165_s2 + $0x20] sm:$0xff]   ;;  %v1624_v6 = vld [vmem:[%s2165_s2 + $0x18] sm:$0xff]   ;;  %v426_v8 = vld [vmem:[%s2164_s1 + $0x10] sm:$0xff]  ;;  %657 = vst [vmem:[#allocation2 + $0x8] sm:$0x3] %v2176_v27  ;;  %vm1658_vm0 = vmmov 0  }
   0xd   : > { %s2201_s22 = smov (!%p410_p3, %s1394_s22), 1  ;;  %1501 = vmatpush3.bf16.msra.mxu0 %v1620_v0  ;;  %1619 = vset.pattern.permute.xlu1 %v1656_v2  ;;  %v424_v7 = vld [vmem:[%s2164_s1] sm:$0xff]  ;;  %v425_v9 = vld [vmem:[%s2164_s1 + $0x8] sm:$0xff]  ;;  %v427_v10 = vld [vmem:[%s2164_s1 + $0x18] sm:$0xff]  ;;  %656 = vst [vmem:[#allocation2] sm:$0xff] %v2176_v27  ;;  %vm1216_vm1 = vcmask 1046528  }
   0xe   : > { %1502 = vmatprep.subr.bf16.mxu0 %v1621_v1  ;;  %s1445_s29 = sshll.u32 %s2201_s22, 5  ;;  %610 = vperm.xlu0 %1618, %v424_v7   ;;  %v1625_v11 = vld [vmem:[%s2165_s2 + $0x10] sm:$0xff]   ;;  %v428_v12 = vld [vmem:[%s2164_s1 + $0x20] sm:$0xff]  ;;  %v429_v13 = vld [vmem:[%s2164_s1 + $0x28] sm:$0xff]  ;;  %658 = vst [vmem:[#allocation2 + $0x49] sm:$0xff] %v2176_v27  ;;  %s1446_s19 = sshll.u32 %s2201_s22, 6 }
   0xf   : > { %s1747_s14 = scalar_lea.vmem %s2163_s0, %s1445_s29  ;;  %620 = vperm.xlu1 %1619, %v426_v8   ;;  %v1626_v14 = vld [vmem:[%s2165_s2 + $0x8] sm:$0xff]   ;;  %v430_v15 = vld [vmem:[%s2164_s1 + $0x30] sm:$0xff]  ;;  %v431_v16 = vld [vmem:[%s2164_s1 + $0x38] sm:$0x7f]  ;;  %659 = vst [vmem:[#allocation2 + $0x51] sm:$0xff] %v2176_v27  ;;  %s2135_s23 = scalar_lea.vmem %s2174_s11, %s1446_s19 }
  0x10   : > { %v1628_v5 = vld [vmem:[%s1747_s14] sm:$0xff]   ;;  %v1632_v18 = vld [vmem:[%s2170_s7 + $0x38] sm:$0xff]   ;;  %v1629_v19 = vld [vmem:[%s1747_s14 + $0x8] sm:$0xff]   ;;  %s422_s28 = scalar_lea.vmem %s2175_s12, %s2201_s22 }
  0x11   : > { %1503 = vmatpush3.bf16.msra.mxu0 %v1621_v1  ;;  %1516 = vmatprep.mubr.bf16.mxu0 %v1628_v5  ;;  %v1627_v17 = vld [vmem:[%s2165_s2] sm:$0xff]   ;;  %v1630_v20 = vld [vmem:[%s1747_s14 + $0x10] sm:$0xff]   ;;  %v1631_v22 = vld [vmem:[%s1747_s14 + $0x18] sm:$0xff]  }
  0x12   : > { %1504 = vmatprep.subr.bf16.mxu0 %v1622_v3  ;;  %615 = vperm.xlu0 %1618, %v425_v9   ;;  %v1633_v21 = vld [vmem:[%s2170_s7 + $0x30] sm:$0xff]   ;;  %v1634_v23 = vld [vmem:[%s2170_s7 + $0x28] sm:$0xff]   ;;  %v1635_v24 = vld [vmem:[%s2170_s7 + $0x20] sm:$0xff]  }
  0x13   : > { %625 = vperm.xlu1 %1619, %v427_v10   ;;  %v1636_v25 = vld [vmem:[%s2170_s7 + $0x18] sm:$0xff]   ;;  %v1638_v26 = vld [vmem:[%s2170_s7 + $0x10] sm:$0xff]   ;;  %v1640_v28 = vld [vmem:[%s2170_s7 + $0x8] sm:$0xff]  }
  0x14   : > { %v1637_v29 = vld [vmem:[%s2168_s5 + $0x38] sm:$0xff]   ;;  %v1642_v30 = vld [vmem:[%s2170_s7] sm:$0xff]   ;;  %v1639_v31 = vld [vmem:[%s2168_s5 + $0x30] sm:$0xff]  }
  0x15   : > { %1505 = vmatpush3.bf16.msra.mxu0 %v1622_v3  ;;  %1524 = vmatprep.subr.bf16.mxu1 %v1637_v29  ;;  %v1641_v32 = vld [vmem:[%s2168_s5 + $0x28] sm:$0xff]   ;;  %v1643_v33 = vld [vmem:[%s2168_s5 + $0x20] sm:$0xff]   ;;  %v1644_v34 = vld [vmem:[%s2168_s5 + $0x18] sm:$0xff]  }
  0x16   : > { %1506 = vmatprep.subr.bf16.mxu0 %v1623_v4  ;;  %630 = vperm.xlu0 %1618, %v428_v12   ;;  %v1645_v35 = vld [vmem:[%s2168_s5 + $0x10] sm:$0xff]   ;;  %v1646_v36 = vld [vmem:[%s2168_s5 + $0x8] sm:$0xff]   ;;  %v1647_v37 = vld [vmem:[%s2168_s5] sm:$0xff]  }
  0x17   : > { %635 = vperm.xlu1 %1619, %v429_v13   ;;  %1525 = vmatpush3.bf16.msra.mxu1 %v1637_v29  ;;  %v1403_v40 = vld [vmem:[%s2166_s3] ss:$0 sm:$0xff]  ;;  %v1862_v45 = vld [vmem:[%s2167_s4 + $0x1] ss:$0 sm:$0xff]  ;;  %v719_v57 = vld [vmem:[#allocation2 + $0x2] sm:$0xff] }
  0x18   : > { %1526 = vmatprep.subr.bf16.mxu1 %v1639_v31  ;;  %v1857_v44 = vld [vmem:[%s2167_s4] ss:$0 sm:$0xff]  ;;  %v690_v46 = vld [vmem:[#allocation2 + $0x1] sm:$0xff]  ;;  %v847_v10 = vld [vmem:[#allocation2 + $0x4b] sm:$0x7f] }
  0x19   : > { %1507 = vmatpush3.bf16.msra.mxu0 %v1623_v4  ;;  %v682_v52 = vmul.f32 0.0, %v1857_v44  ;;  %v703_v53 = vmul.f32 %v1862_v45, %v690_v46  ;;  %v1878_v63 = vld [vmem:[%s2167_s4 + $0x2] ss:$0 sm:$0xff]  ;;  %v1887_v9 = vld [vmem:[%s2167_s4 + $0x4] ss:$0 sm:$0xff] }
  0x1a   : > { %1508 = vmatprep.subr.bf16.mxu0 %v1624_v6  ;;  %640 = vperm.xlu0 %1618, %v430_v15   ;;  %v732_v2 = vmul.f32 %v1878_v63, %v719_v57  ;;  %v876_v15 = vld [vmem:[#allocation2 + $0x4c] sm:$0x7f] }
  0x1b   : > { %645 = vperm.xlu1 %1619, %v431_v16   ;;  %1527 = vmatpush3.bf16.msra.mxu1 %v1639_v31  ;;  %v711_v1 = vadd.f32 %v703_v53, %v682_v52 }
  0x1c   : > { %1528 = vmatprep.subr.bf16.mxu1 %v1641_v32 }
  0x1d   : > { %1509 = vmatpush3.bf16.msra.mxu0 %v1624_v6  ;;  %v824_v6 = vld [vmem:[#allocation2 + $0x4a] sm:$0x7f] }
  0x1e   : > { %1510 = vmatprep.subr.bf16.mxu0 %v1625_v11 }
  0x1f   : > { %1529 = vmatpush3.bf16.msra.mxu1 %v1641_v32 }
  0x20   : > { %1530 = vmatprep.subr.bf16.mxu1 %v1643_v33 }
  0x21   : > { %1511 = vmatpush3.bf16.msra.mxu0 %v1625_v11 }
  0x22   : > { %1512 = vmatprep.subr.bf16.mxu0 %v1626_v14 }
  0x23   : > { %1531 = vmatpush3.bf16.msra.mxu1 %v1643_v33 }
  0x24   : > { %1532 = vmatprep.subr.bf16.mxu1 %v1644_v34 }
  0x25   : > { %1513 = vmatpush3.bf16.msra.mxu0 %v1626_v14  ;;  %v1893_v14 = vld [vmem:[%s2167_s4 + $0x6] ss:$0 sm:$0xff] }
  0x26   : > { %1514 = vmatprep.subr.bf16.mxu0 %v1627_v17 }
  0x27   : > { %1533 = vmatpush3.bf16.msra.mxu1 %v1644_v34 }
  0x28   : > { %1534 = vmatprep.subr.bf16.mxu1 %v1645_v35 }
  0x29   : > { %1515 = vmatpush3.bf16.msra.mxu0 %v1627_v17 }
  0x2a   : > { %1548 = vmatprep.subr.bf16.mxu0 %v1632_v18 }
  0x2b   : > { %1535 = vmatpush3.bf16.msra.mxu1 %v1645_v35 }
  0x2c   : > { %1517 = vmatmul.mubr.bf16.vlgmr.msra.gmra.mxu0 %v1629_v19  ;;  %1536 = vmatprep.subr.bf16.mxu1 %v1646_v36  ;;  %v1900_v19 = vld [vmem:[%s2167_s4 + $0x7] ss:$0 sm:$0xff] }
  0x2d   : > { %1520 = vmatprep.mubr.bf16.mxu0 %v1630_v20  ;;  %1549 = vmatpush3.bf16.msra.mxu0 %v1632_v18  ;;  %v740_v18 = vadd.f32 %v732_v2, %v711_v1  ;;  %v1903_v20 = vmul.f32 %v1893_v14, %v824_v6 }
  0x2e   : > { %1550 = vmatprep.subr.bf16.mxu0 %v1633_v21 }
  0x2f   : > { %1537 = vmatpush3.bf16.msra.mxu1 %v1646_v36  ;;  %v1933_v36 = vld [vmem:[%s2167_s4 + $0x3] ss:$0 sm:$0xff] }
  0x30   : > { %1538 = vmatprep.subr.bf16.mxu1 %v1647_v37 }
  0x31   : > { %1551 = vmatpush3.bf16.msra.mxu0 %v1633_v21 }
  0x32   : > { %1552 = vmatprep.subr.bf16.mxu0 %v1634_v23 }
  0x33   : > { %1539 = vmatpush3.bf16.msra.mxu1 %v1647_v37 }
  0x34   : > { %1521 = vmatmul.mubr.bf16.gmra.mxu0 %v1631_v22  ;;  %1572 = vmatprep.subr.mxu1 %v2176_v27 }
  0x35   : > { %1553 = vmatpush3.bf16.msra.mxu0 %v1634_v23 }
  0x36   : > { %1554 = vmatprep.subr.bf16.mxu0 %v1635_v24 }
  0x39   : > { %1555 = vmatpush3.bf16.msra.mxu0 %v1635_v24  ;;  %v1911_v24 = vld [vmem:[%s2167_s4 + $0x8] ss:$0 sm:$0xff] }
  0x3a   : > { %1556 = vmatprep.subr.bf16.mxu0 %v1636_v25  ;;  %v1925_v31 = vmul.f32 %v1911_v24, %v876_v15 }
  0x3d   : > { %1557 = vmatpush3.bf16.msra.mxu0 %v1636_v25  ;;  %v1914_v25 = vmul.f32 %v1900_v19, %v847_v10 }
  0x3e   : > { %1558 = vmatprep.subr.bf16.mxu0 %v1638_v26 }
  0x41   : > { %1559 = vmatpush3.bf16.msra.mxu0 %v1638_v26 }
  0x42   : > { %1560 = vmatprep.subr.bf16.mxu0 %v1640_v28 }
  0x45   : > { %1561 = vmatpush3.bf16.msra.mxu0 %v1640_v28 }
  0x46   : > { %1562 = vmatprep.subr.bf16.mxu0 %v1642_v30 }
  0x49   : > { %1563 = vmatpush3.bf16.msra.mxu0 %v1642_v30 }
  0x89   : > { %v1845_v38 = vpop.permute.xlu0 %610 }
  0x8a   : > { %v1847_v39 = vpop.permute.xlu1 %620 }
  0x8b   : > { %2185 = vst [vmem:[#allocation3_spill] sm:$0xff] %v1847_v39 }
  0x8d   : > { %v1852_v41 = vpop.permute.xlu0 %615 }
  0x8e   : > { %2186 = vst [vmem:[#allocation4_spill] sm:$0xff] %v1852_v41  ;;  %v1864_v50 = vpop.permute.xlu1 %625 }
  0x8f   : > { %2187 = vst [vmem:[#allocation5_spill] sm:$0xff] %v1864_v50 }
  0x91   : > { %v1871_v58 = vpop.permute.xlu0 %630 }
  0x92   : > { %2188 = vst [vmem:[#allocation6_spill] sm:$0xff] %v1871_v58  ;;  %v1882_v7 = vpop.permute.xlu1 %635 }
  0x93   : > { %2189 = vst [vmem:[#allocation7_spill] sm:$0xff] %v1882_v7 }
  0x95   : > { %v1895_v16 = vpop.permute.xlu0 %640 }
  0x96   : > { %2190 = vst [vmem:[#allocation8_spill] sm:$0xff] %v1895_v16  ;;  %v1935_v37 = vpop.permute.xlu1 %645 }
  0x97   : > { %2191 = vst [vmem:[#allocation9_spill] sm:$0xff] %v1935_v37 }
  0xec   : > { %v1518_v42 = vpop.f32.mrf.mxu0 }
  0xed   : > { %v578_v43 = vadd.f32 %v1518_v42, %v1403_v40 }
  0xee   : > { %v569_v47 = vpop.f32.mrf.mxu0 }
  0xef   : > { %v602_v48 = vmax.f32 %v578_v43, 0.0  ;;  %v570_v49 = vadd.f32 %v1403_v40, %v569_v47 }
  0xf0   : > { %v1519_v51 = vpop.f32.mrf.mxu0 }
  0xf1   : > { %v1869_v54 = vmul.f32 %v1847_v39, %v602_v48  ;;  %v600_v55 = vmax.f32 %v570_v49, 0.0  ;;  %v581_v56 = vadd.f32 %v1519_v51, %v1403_v40 }
  0xf2   : > { %v572_v59 = vpop.f32.mrf.mxu0 }
  0xf3   : > { %663 = vst [vmem:[#allocation2 + $0x1a] sm:$0xff] %v1869_v54  ;;  %v648_v60 = vmul.f32 %v1845_v38, %v600_v55  ;;  %v603_v61 = vmax.f32 %v581_v56, 0.0  ;;  %v573_v62 = vadd.f32 %v1403_v40, %v572_v59  ;;  %v1918_v29 = vmul.f32 %v1887_v9, %v1869_v54 }
  0xf4   : > { %v1522_v0 = vpop.f32.mrf.mxu0  ;;  %v1922_v30 = vmul.f32 %v1893_v14, %v1869_v54  ;;  %v1941_v48 = vmul.f32 %v1878_v63, %v1869_v54 }
  0xf5   : > { %661 = vst [vmem:[#allocation2 + $0xa] sm:$0xff] %v648_v60  ;;  %v651_v3 = vmul.f32 %v1864_v50, %v603_v61  ;;  %v601_v4 = vmax.f32 %v573_v62, 0.0  ;;  %v594_v5 = vadd.f32 %v1522_v0, %v1403_v40  ;;  %v733_v46 = vmul.f32 %v1878_v63, %v648_v60  ;;  %v1963_v61 = vld [vmem:[%s2167_s4 + $0x5] ss:$0 sm:$0xff] }
  0xf6   : > { %v585_v8 = vpop.f32.mrf.mxu0  ;;  %v778_v47 = vmul.f32 %v1887_v9, %v648_v60 }
  0xf7   : > { %664 = vst [vmem:[#allocation2 + $0x22] sm:$0xff] %v651_v3  ;;  %v649_v11 = vmul.f32 %v1852_v41, %v601_v4  ;;  %v606_v12 = vmax.f32 %v594_v5, 0.0  ;;  %v586_v13 = vadd.f32 %v1403_v40, %v585_v8  ;;  %v1039_v35 = vpack.c.bf16 %v651_v3, %v1869_v54 }
  0xf8   : > { %v1523_v17 = vpop.f32.mrf.mxu0  ;;  %v1952_v57 = vmul.f32 %v1893_v14, %v651_v3  ;;  %v1955_v54 = vmul.f32 %v1878_v63, %v651_v3 }
  0xf9   : > { %662 = vst [vmem:[#allocation2 + $0x12] sm:$0xff] %v649_v11  ;;  %v1906_v21 = vmul.f32 %v1895_v16, %v606_v12  ;;  %v604_v22 = vmax.f32 %v586_v13, 0.0  ;;  %v597_v23 = vadd.f32 %v1523_v17, %v1403_v40  ;;  %v1038_v28 = vpack.c.bf16 %v649_v11, %v648_v60 }
  0xfa   : > { %v588_v26 = vpop.f32.mrf.mxu0  ;;  %v734_v55 = vmul.f32 %v1878_v63, %v649_v11  ;;  %v779_v62 = vmul.f32 %v1887_v9, %v649_v11  ;;  %v830_v1 = vmul.f32 %v1893_v14, %v649_v11 }
  0xfb   : > { %667 = vst [vmem:[#allocation2 + $0x3a] sm:$0xff] %v1906_v21  ;;  %v652_v32 = vmul.f32 %v1871_v58, %v604_v22  ;;  %v607_v33 = vmax.f32 %v597_v23, 0.0  ;;  %v589_v34 = vadd.f32 %v1403_v40, %v588_v26  ;;  %1564 = vmatprep.mubr.bf16.mxu0 %v1038_v28  ;;  %v1944_v40 = vmul.f32 %v1887_v9, %v651_v3 }
  0xfc   : > { %v670_v42 = vld [vmem:[#allocation2 + $0x8] sm:$0xff]  ;;  %1565 = vmatmul.mubr.bf16.vlgmr.msra.gmra.mxu0 %v1039_v35  ;;  %v1972_v5 = vmul.f32 %v1887_v9, %v1906_v21  ;;  %v1976_v6 = vmul.f32 %v1893_v14, %v1906_v21 }
  0xfd   : > { %v691_v43 = vld [vmem:[#allocation2 + $0x9] sm:$0xff]  ;;  %665 = vst [vmem:[#allocation2 + $0x2a] sm:$0xff] %v652_v32  ;;  %v655_v49 = vmul.f32 %v1935_v37, %v607_v33  ;;  %v605_v51 = vmax.f32 %v589_v34, 0.0  ;;  %v683_v52 = vmul.f32 %v1857_v44, %v670_v42  ;;  %v1968_v3 = vmul.f32 %v1878_v63, %v652_v32 }
  0xfe   : > { %v704_v53 = vmul.f32 %v1862_v45, %v691_v43  ;;  %v755_v56 = vmul.f32 %v1933_v36, %v691_v43  ;;  %v796_v0 = vld [vmem:[#allocation2 + $0x1b] sm:$0xff]  ;;  %v1982_v15 = vmul.f32 %v1887_v9, %v652_v32  ;;  %v1988_v34 = vmul.f32 %v1893_v14, %v652_v32 }
  0xff   : > { %668 = vst [vmem:[#allocation2 + $0x42] sm:$0x7f] %v655_v49  ;;  %v1958_v59 = vmul.f32 %v1882_v7, %v605_v51  ;;  %v870_v10 = vld [vmem:[#allocation2 + $0x1c] sm:$0xff] }
 0x100   : > { %v712_v60 = vadd.f32 %v704_v53, %v683_v52  ;;  %v671_v2 = vld [vmem:[#allocation2 + $0x10] sm:$0xff]  ;;  %v763_v8 = vadd.f32 %v755_v56, %v740_v18  ;;  %v694_v22 = vld [vmem:[#allocation2 + $0x21] sm:$0xff]  ;;  %v693_v26 = vld [vmem:[#allocation2 + $0x19] sm:$0xff]  ;;  %v809_v18 = vmul.f32 %v1963_v61, %v796_v0  ;;  %v883_v49 = vmul.f32 %v1911_v24, %v870_v10 }
 0x101   : > { %v692_v4 = vld [vmem:[#allocation2 + $0x11] sm:$0xff]  ;;  %666 = vst [vmem:[#allocation2 + $0x32] sm:$0xff] %v1958_v59  ;;  %v684_v12 = vmul.f32 %v1857_v44, %v671_v2  ;;  %v1040_v23 = vpack.c.bf16 %v1958_v59, %v652_v32  ;;  %v1996_v2 = vmul.f32 %v1862_v45, %v694_v22  ;;  %v758_v32 = vmul.f32 %v1933_v36, %v694_v22 }
 0x102   : > { %v705_v11 = vmul.f32 %v1862_v45, %v692_v4  ;;  %v741_v13 = vadd.f32 %v733_v46, %v712_v60  ;;  %v794_v17 = vld [vmem:[#allocation2 + $0xb] sm:$0xff]  ;;  %v756_v28 = vmul.f32 %v1933_v36, %v692_v4  ;;  %v795_v33 = vld [vmem:[#allocation2 + $0x13] sm:$0xff]  ;;  %v786_v43 = vadd.f32 %v778_v47, %v763_v8 }
 0x103   : > { %v726_v42 = vld [vmem:[#allocation2 + $0x3a] sm:$0x7f]  ;;  %v854_v46 = vmul.f32 %v1900_v19, %v796_v0  ;;  %1568 = vmatprep.mubr.bf16.mxu0 %v1040_v23  ;;  %v807_v56 = vmul.f32 %v1963_v61, %v794_v17  ;;  %v738_v47 = vmul.f32 %v1878_v63, %v1958_v59  ;;  %v757_v0 = vmul.f32 %v1933_v36, %v693_v26 }
 0x104   : > { %v713_v35 = vadd.f32 %v705_v11, %v684_v12  ;;  %v674_v51 = vld [vmem:[#allocation2 + $0x28] sm:$0xff]  ;;  %v764_v53 = vadd.f32 %v756_v28, %v741_v13  ;;  %v672_v60 = vld [vmem:[#allocation2 + $0x18] sm:$0xff]  ;;  %v808_v8 = vmul.f32 %v1963_v61, %v795_v33  ;;  %v2008_v23 = vmul.f32 %v1887_v9, %v1958_v59 }
 0x105   : > { %v1992_v52 = vld [vmem:[#allocation2 + $0x29] sm:$0xff]  ;;  %v687_v10 = vmul.f32 %v1857_v44, %v674_v51  ;;  %v815_v17 = vadd.f32 %v807_v56, %v786_v43  ;;  %v706_v22 = vmul.f32 %v1862_v45, %v693_v26  ;;  %v869_v28 = vld [vmem:[#allocation2 + $0x14] sm:$0xff]  ;;  %v853_v26 = vmul.f32 %v1900_v19, %v795_v33 }
 0x106   : > { %v742_v4 = vadd.f32 %v734_v55, %v713_v35  ;;  %v708_v12 = vmul.f32 %v1862_v45, %v1992_v52  ;;  %v772_v11 = vld [vmem:[#allocation2 + $0x42] sm:$0x7f]  ;;  %v787_v13 = vadd.f32 %v779_v62, %v764_v53  ;;  %v739_v55 = vmul.f32 %v1878_v63, %v726_v42 }
 0x107   : > { %v685_v35 = vmul.f32 %v1857_v44, %v672_v60  ;;  %v1041_v37 = vpack.c.bf16 %v772_v11, %v1906_v21  ;;  %v838_v62 = vadd.f32 %v830_v1, %v815_v17  ;;  %v797_v42 = vld [vmem:[#allocation2 + $0x23] sm:$0xff] }
 0x108   : > { %v675_v27 = vld [vmem:[#allocation2 + $0x30] sm:$0xff]  ;;  %v676_v51 = vld [vmem:[#allocation2 + $0x38] sm:$0x7f]  ;;  %v765_v7 = vadd.f32 %v757_v0, %v742_v4  ;;  %v816_v58 = vadd.f32 %v808_v8, %v787_v13  ;;  %v716_v50 = vadd.f32 %v708_v12, %v687_v10  ;;  %v749_v41 = vld [vmem:[#allocation2 + $0x41] sm:$0x7f]  ;;  %v882_v0 = vmul.f32 %v1911_v24, %v869_v28 }
 0x109   : > { %v696_v16 = vld [vmem:[#allocation2 + $0x31] sm:$0xff]  ;;  %v688_v43 = vmul.f32 %v1857_v44, %v675_v27  ;;  %v689_v56 = vmul.f32 %v1857_v44, %v676_v51  ;;  %v697_v63 = vld [vmem:[#allocation2 + $0x39] sm:$0x7f]  ;;  %1569 = vmatmul.mubr.bf16.gmra.mxu0 %v1041_v37  ;;  %v861_v27 = vadd.f32 %v853_v26, %v838_v62  ;;  %v714_v8 = vadd.f32 %v706_v22, %v685_v35  ;;  %v673_v10 = vld [vmem:[#allocation2 + $0x20] sm:$0xff] }
 0x10a   : > { %v709_v53 = vmul.f32 %v1862_v45, %v696_v16  ;;  %v710_v60 = vmul.f32 %v1862_v45, %v697_v63  ;;  %v748_v39 = vld [vmem:[#allocation2 + $0x39] sm:$0xff]  ;;  %v788_v21 = vadd.f32 %v1918_v29, %v765_v7  ;;  %v839_v1 = vadd.f32 %v1922_v30, %v816_v58  ;;  %v801_v22 = vld [vmem:[#allocation2 + $0x43] sm:$0x7f]  ;;  %v872_v26 = vld [vmem:[#allocation2 + $0x2c] sm:$0xff] }
 0x10b   : > { %v810_v33 = vmul.f32 %v1963_v61, %v797_v42  ;;  %v761_v45 = vmul.f32 %v1933_v36, %v748_v39  ;;  %v762_v37 = vmul.f32 %v1933_v36, %v749_v41  ;;  %v743_v7 = vadd.f32 %v1941_v48, %v714_v8 }
 0x10c   : > { %v717_v4 = vadd.f32 %v709_v53, %v688_v43  ;;  %v718_v13 = vadd.f32 %v710_v60, %v689_v56  ;;  %v817_v17 = vadd.f32 %v809_v18, %v788_v21  ;;  %v862_v51 = vadd.f32 %v854_v46, %v839_v1  ;;  %v798_v18 = vld [vmem:[#allocation2 + $0x2b] sm:$0xff]  ;;  %v823_v60 = vld [vmem:[#allocation2 + $0x42] sm:$0xff] }
 0x10d   : > { %v745_v58 = vadd.f32 %v1968_v3, %v716_v50  ;;  %v890_v30 = vadd.f32 %v882_v0, %v861_v27  ;;  %v766_v35 = vadd.f32 %v758_v32, %v743_v7  ;;  %v686_v43 = vmul.f32 %v1857_v44, %v673_v10  ;;  %v871_v50 = vld [vmem:[#allocation2 + $0x24] sm:$0xff] }
 0x10e   : > { %v746_v12 = vadd.f32 %v738_v47, %v717_v4  ;;  %v747_v29 = vadd.f32 %v739_v55, %v718_v13  ;;  %v891_v62 = vadd.f32 %v883_v49, %v862_v51  ;;  %v840_v46 = vadd.f32 %v1952_v57, %v817_v17  ;;  %v800_v55 = vld [vmem:[#allocation2 + $0x3b] sm:$0xff]  ;;  %v846_v0 = vld [vmem:[#allocation2 + $0x43] sm:$0xff] }
 0x10f   : > { %v785_v39 = vmul.f32 %v1887_v9, %v772_v11  ;;  %v855_v41 = vmul.f32 %v1900_v19, %v797_v42  ;;  %v789_v48 = vadd.f32 %v1944_v40, %v766_v35  ;;  %v715_v3 = vadd.f32 %v1996_v2, %v686_v43  ;;  %v799_v11 = vld [vmem:[#allocation2 + $0x33] sm:$0xff]  ;;  %v875_v7 = vld [vmem:[#allocation2 + $0x44] sm:$0xff] }
 0x110   : > { %v769_v28 = vadd.f32 %v761_v45, %v746_v12  ;;  %v770_v47 = vadd.f32 %v762_v37, %v747_v29  ;;  %v898_v53 = vpack.c.bf16 %v891_v62, %v890_v30  ;;  %v759_v49 = vmul.f32 %v1933_v36, %v1992_v52  ;;  %v874_v45 = vld [vmem:[#allocation2 + $0x3c] sm:$0xff] }
 0x111   : > { %v760_v32 = vmul.f32 %v1933_v36, %v696_v16  ;;  %v814_v56 = vmul.f32 %v1963_v61, %v801_v22  ;;  %v811_v9 = vmul.f32 %v1963_v61, %v798_v18  ;;  %v818_v63 = vadd.f32 %v810_v33, %v789_v48 }
 0x112   : > { %v792_v57 = vadd.f32 %v1972_v5, %v769_v28  ;;  %v793_v44 = vadd.f32 %v785_v39, %v770_v47  ;;  %1540 = vmatprep.mubr.bf16.mxu1 %v898_v53  ;;  %v863_v40 = vadd.f32 %v855_v41, %v840_v46  ;;  %v744_v2 = vadd.f32 %v1955_v54, %v715_v3  ;;  %v1237_v3 = vld [vmem:[%s2172_s9 + $0x58] sm:$0xff] }
 0x113   : > { %v768_v42 = vadd.f32 %v760_v32, %v745_v58  ;;  %v856_v16 = vmul.f32 %v1900_v19, %v798_v18  ;;  %v884_v36 = vmul.f32 %v1911_v24, %v871_v50  ;;  %v813_v5 = vmul.f32 %v1963_v61, %v800_v55  ;;  %v1238_v50 = vld [vmem:[%s2172_s9 + $0x60] sm:$0xff]  ;;  %v1235_v32 = vld [vmem:[%s2172_s9 + $0x48] sm:$0xff] }
 0x114   : > { %v822_v52 = vadd.f32 %v814_v56, %v793_v44  ;;  %v841_v21 = vadd.f32 %v1988_v34, %v818_v63  ;;  %v767_v1 = vadd.f32 %v759_v49, %v744_v2  ;;  %v812_v27 = vmul.f32 %v1963_v61, %v799_v11  ;;  %v1236_v49 = vld [vmem:[%s2172_s9 + $0x50] sm:$0xff]  ;;  %v1231_v56 = vld [vmem:[%s2172_s9 + $0x28] sm:$0xff] }
 0x115   : > { %v791_v4 = vadd.f32 %v2008_v23, %v768_v42  ;;  %v885_v8 = vmul.f32 %v1911_v24, %v872_v26  ;;  %v821_v54 = vadd.f32 %v813_v5, %v792_v57  ;;  %v836_v13 = vmul.f32 %v1893_v14, %v823_v60  ;;  %v1233_v57 = vld [vmem:[%s2172_s9 + $0x38] sm:$0xff]  ;;  %v1232_v44 = vld [vmem:[%s2172_s9 + $0x30] sm:$0xff]  ;;  %v1226_v26 = vld [vmem:[%s2172_s9] sm:$0xff] }
 0x116   : > { %v845_v17 = vadd.f32 %v1903_v20, %v822_v52  ;;  %v864_v51 = vadd.f32 %v856_v16, %v841_v21  ;;  %v892_v33 = vadd.f32 %v884_v36, %v863_v40  ;;  %v790_v10 = vadd.f32 %v1982_v15, %v767_v1  ;;  %v873_v20 = vld [vmem:[#allocation2 + $0x34] sm:$0xff]  ;;  %v1227_v40 = vld [vmem:[%s2172_s9 + $0x8] sm:$0xff]  ;;  %v1434_v52 = vld [vmem:[%s2171_s8] ss:$0 sm:$0xff] }
 0x117   : > { %v820_v12 = vadd.f32 %v812_v27, %v791_v4  ;;  %v834_v34 = vmul.f32 %v1893_v14, %v1958_v59  ;;  %v858_v23 = vmul.f32 %v1900_v19, %v800_v55  ;;  %v844_v61 = vadd.f32 %v836_v13, %v821_v54  ;;  %v1234_v55 = vld [vmem:[%s2172_s9 + $0x40] sm:$0xff]  ;;  %v1228_v63 = vld [vmem:[%s2172_s9 + $0x10] sm:$0xff] }
 0x118   : > { %v859_v37 = vmul.f32 %v1900_v19, %v846_v0  ;;  %v893_v58 = vadd.f32 %v885_v8, %v864_v51  ;;  %v819_v29 = vadd.f32 %v811_v9, %v790_v10  ;;  %v868_v62 = vadd.f32 %v1914_v25, %v845_v17  ;;  %v1230_v9 = vld [vmem:[%s2172_s9 + $0x20] sm:$0xff] }
 0x119   : > { %v843_v30 = vadd.f32 %v1976_v6, %v820_v12  ;;  %v857_v15 = vmul.f32 %v1900_v19, %v799_v11  ;;  %v887_v28 = vmul.f32 %v1911_v24, %v874_v45  ;;  %v888_v18 = vmul.f32 %v1911_v24, %v875_v7  ;;  %v1241_v19 = vld [vmem:[%s2172_s9 + $0x78] sm:$0xff]  ;;  %v1425_v16 = vld [vmem:[%s2169_s6] ss:$0 sm:$0xff] }
 0x11a   : > { %v867_v22 = vadd.f32 %v859_v37, %v844_v61  ;;  %v899_v35 = vpack.c.bf16 %v893_v58, %v892_v33  ;;  %v842_v14 = vadd.f32 %v834_v34, %v819_v29  ;;  %v886_v46 = vmul.f32 %v1911_v24, %v873_v20  ;;  %v1240_v24 = vld [vmem:[%s2172_s9 + $0x70] sm:$0xff]  ;;  %v1229_v11 = vld [vmem:[%s2172_s9 + $0x18] sm:$0xff] }
 0x11b   : > { %v866_v59 = vadd.f32 %v858_v23, %v843_v30  ;;  %v897_v6 = vadd.f32 %v1925_v31, %v868_v62  ;;  %v2192_v48 = vmov 0.0   ;;  %v1239_v31 = vld [vmem:[%s2172_s9 + $0x68] sm:$0xff] }
 0x11c   : > { %1541 = vmatmul.mubr.bf16.vlgmr.msra.gmra.mxu1 %v899_v35  ;;  %v865_v43 = vadd.f32 %v857_v15, %v842_v14  ;;  %v896_v39 = vadd.f32 %v888_v18, %v867_v22 }
 0x11d   : > { %v895_v47 = vadd.f32 %v887_v28, %v866_v59  ;;  %1573 = vmatpush3.msra.mxu1 %v1241_v19 }
 0x11e   : > { %v894_v53 = vadd.f32 %v886_v46, %v865_v43  ;;  %v901_v41 = vpack.c.bf16 %v897_v6, %v896_v39  ;;  %1574 = vmatprep.subr.mxu1 %v2192_v48 }
 0x11f   : > { %1575 = vmatpush3.msra.mxu1 %v1240_v24 }
 0x120   : > { %v900_v25 = vpack.c.bf16 %v895_v47, %v894_v53  ;;  %1576 = vmatprep.subr.mxu1 %v2192_v48  ;;  %v2193_v47 = vld [vmem:[#allocation4_spill] sm:$0xff] }
 0x121   : > { %1577 = vmatpush3.msra.mxu1 %v1239_v31 }
 0x122   : > { %1544 = vmatprep.mubr.bf16.mxu1 %v900_v25  ;;  %1578 = vmatprep.subr.mxu1 %v2192_v48 }
 0x123   : > { %1579 = vmatpush3.msra.mxu1 %v1238_v50 }
 0x124   : > { %1545 = vmatmul.mubr.bf16.gmra.mxu1 %v901_v41  ;;  %1580 = vmatprep.subr.mxu1 %v2192_v48  ;;  %v2194_v41 = vld [vmem:[#allocation3_spill] sm:$0xff] }
 0x125   : > { %1581 = vmatpush3.msra.mxu1 %v1237_v3  ;;  %1604 = vmatprep.mubr.msk.f32.mxu1 %vm1658_vm0, %v2192_v48 }
 0x126   : > { %1582 = vmatprep.subr.mxu1 %v2192_v48 }
 0x127   : > { %1583 = vmatpush3.msra.mxu1 %v1236_v49 }
 0x128   : > { %1584 = vmatprep.subr.mxu1 %v2192_v48 }
 0x129   : > { %1585 = vmatpush3.msra.mxu1 %v1235_v32 }
 0x12a   : > { %1586 = vmatprep.subr.mxu1 %v2192_v48 }
 0x12b   : > { %1587 = vmatpush3.msra.mxu1 %v1234_v55 }
 0x12c   : > { %1588 = vmatprep.subr.mxu1 %v2192_v48 }
 0x12d   : > { %1589 = vmatpush3.msra.mxu1 %v1233_v57  ;;  %v2196_v57 = vld [vmem:[#allocation6_spill] sm:$0xff] }
 0x12e   : > { %1590 = vmatprep.subr.mxu1 %v2192_v48 }
 0x12f   : > { %1591 = vmatpush3.msra.mxu1 %v1232_v44 }
 0x130   : > { %1592 = vmatprep.subr.mxu1 %v2192_v48 }
 0x131   : > { %1593 = vmatpush3.msra.mxu1 %v1231_v56 }
 0x132   : > { %1594 = vmatprep.subr.mxu1 %v2192_v48 }
 0x133   : > { %1595 = vmatpush3.msra.mxu1 %v1230_v9 }
 0x134   : > { %1596 = vmatprep.subr.mxu1 %v2192_v48 }
 0x135   : > { %1597 = vmatpush3.msra.mxu1 %v1229_v11 }
 0x136   : > { %1598 = vmatprep.subr.mxu1 %v2192_v48 }
 0x137   : > { %1599 = vmatpush3.msra.mxu1 %v1228_v63 }
 0x138   : > { %1600 = vmatprep.subr.mxu1 %v2192_v48 }
 0x139   : > { %1601 = vmatpush3.msra.mxu1 %v1227_v40 }
 0x13a   : > { %1602 = vmatprep.subr.mxu1 %v2192_v48 }
 0x13b   : > { %1603 = vmatpush3.msra.mxu1 %v1226_v26  ;;  %v2197_v26 = vld [vmem:[#allocation7_spill] sm:$0xff] }
 0x1bc   : > { %v1566_v2 = vpop.f32.mrf.mxu0 }
 0x1bd   : > { %v1156_v21 = vadd.f32 %v1566_v2, %v1434_v52 }
 0x1be   : > { %v1147_v42 = vpop.f32.mrf.mxu0 }
 0x1bf   : > { %v1148_v0 = vadd.f32 %v1434_v52, %v1147_v42  ;;  %v2198_v42 = vld [vmem:[#allocation9_spill] sm:$0xff] }
 0x1c0   : > { %v1567_v60 = vpop.f32.mrf.mxu0 }
 0x1c1   : > { %v1159_v17 = vadd.f32 %v1567_v60, %v1434_v52 }
 0x1c2   : > { %v1150_v36 = vpop.f32.mrf.mxu0 }
 0x1c3   : > { %v1151_v45 = vadd.f32 %v1434_v52, %v1150_v36  ;;  %v2199_v36 = vld [vmem:[#allocation8_spill] sm:$0xff] }
 0x1c9   : > { %v1570_v1 = vpop.f32.mrf.mxu0 }
 0x1ca   : > { %v1172_v7 = vadd.f32 %v1570_v1, %v1434_v52 }
 0x1cb   : > { %v1163_v51 = vpop.f32.mrf.mxu0 }
 0x1cc   : > { %v1164_v20 = vadd.f32 %v1434_v52, %v1163_v51  ;;  %v1242_v51 = vld [vmem:[%s2173_s10] sm:$0x1] }
 0x1cd   : > { %v1571_v58 = vpop.f32.mrf.mxu0 }
 0x1ce   : > { %v1175_v14 = vadd.f32 %v1571_v58, %v1434_v52 }
 0x1cf   : > { %v1166_v46 = vpop.f32.mrf.mxu0 }
 0x1d0   : > { %v1167_v50 = vadd.f32 %v1434_v52, %v1166_v46 }
 0x1dc   : > { %v1542_v5 = vpop.f32.mrf.mxu1 }
 0x1dd   : > { %v1016_v4 = vadd.f32 %v1542_v5, %v1425_v16 }
 0x1de   : > { %v1007_v27 = vpop.f32.mrf.mxu1 }
 0x1df   : > { %v1180_v8 = vadd.f32 %v1156_v21, %v1016_v4  ;;  %v1008_v54 = vadd.f32 %v1425_v16, %v1007_v27 }
 0x1e0   : > { %v1543_v13 = vpop.f32.mrf.mxu1 }
 0x1e1   : > { %1188 = vst [vmem:[%s2135_s23 + $0x10] sm:$0xff] %v1180_v8  ;;  %v1178_v33 = vadd.f32 %v1148_v0, %v1008_v54  ;;  %v1019_v10 = vadd.f32 %v1543_v13, %v1425_v16  ;;  %v1196_v15 = vmax.f32 %v1180_v8, 0.0 }
 0x1e2   : > { %v1010_v12 = vpop.f32.mrf.mxu1 }
 0x1e3   : > { %1186 = vst [vmem:[%s2135_s23] sm:$0xff] %v1178_v33  ;;  %v1181_v34 = vadd.f32 %v1159_v17, %v1019_v10  ;;  %v1011_v23 = vadd.f32 %v1425_v16, %v1010_v12  ;;  %v1194_v61 = vmax.f32 %v1178_v33, 0.0  ;;  %v1204_v19 = vmul.f32 %v1196_v15, %v2194_v41 }
 0x1e4   : > { %v1546_v37 = vpop.f32.mrf.mxu1 }
 0x1e5   : > { %1189 = vst [vmem:[%s2135_s23 + $0x18] sm:$0xff] %v1181_v34  ;;  %v1179_v29 = vadd.f32 %v1151_v45, %v1011_v23  ;;  %v1032_v30 = vadd.f32 %v1546_v37, %v1425_v16  ;;  %v1202_v59 = vmul.f32 %v1194_v61, %v1845_v38  ;;  %v1197_v43 = vmax.f32 %v1181_v34, 0.0  ;;  %v2195_v38 = vld [vmem:[#allocation5_spill] sm:$0xff] }
 0x1e6   : > { %v1023_v62 = vpop.f32.mrf.mxu1 }
 0x1e7   : > { %1187 = vst [vmem:[%s2135_s23 + $0x8] sm:$0xff] %v1179_v29  ;;  %v1195_v28 = vmax.f32 %v1179_v29, 0.0  ;;  %v1184_v22 = vadd.f32 %v1172_v7, %v1032_v30  ;;  %v1024_v35 = vadd.f32 %v1425_v16, %v1023_v62  ;;  %v1205_v49 = vmul.f32 %v1197_v43, %v2195_v38 }
 0x1e8   : > { %v1547_v18 = vpop.f32.mrf.mxu1 }
 0x1e9   : > { %v1203_v39 = vmul.f32 %v1195_v28, %v2193_v47  ;;  %1192 = vst [vmem:[%s2135_s23 + $0x30] sm:$0xff] %v1184_v22  ;;  %v1182_v6 = vadd.f32 %v1164_v20, %v1024_v35  ;;  %v1035_v53 = vadd.f32 %v1547_v18, %v1425_v16  ;;  %v1200_v11 = vmax.f32 %v1184_v22, 0.0 }
 0x1ea   : > { %v1026_v25 = vpop.f32.mrf.mxu1 }
 0x1eb   : > { %v1210_v48 = vadd.f32 %v1203_v39, %v1202_v59  ;;  %1190 = vst [vmem:[%s2135_s23 + $0x20] sm:$0xff] %v1182_v6  ;;  %v1198_v24 = vmax.f32 %v1182_v6, 0.0  ;;  %v1185_v31 = vadd.f32 %v1175_v14, %v1035_v53  ;;  %v1027_v3 = vadd.f32 %v1425_v16, %v1026_v25 }
 0x1ec   : > { %v1208_v52 = vmul.f32 %v1200_v11, %v2199_v36 }
 0x1ed   : > { %v1211_v32 = vadd.f32 %v1210_v48, %v1204_v19  ;;  %1193 = vst [vmem:[%s2135_s23 + $0x38] sm:$0x7f] %v1185_v31  ;;  %v1183_v55 = vadd.f32 %v1167_v50, %v1027_v3  ;;  %v1206_v44 = vmul.f32 %v1198_v24, %v2196_v57  ;;  %v1201_v9 = vmax.f32 %v1185_v31, 0.0 }
 0x1ef   : > { %v1212_v56 = vadd.f32 %v1211_v32, %v1205_v49  ;;  %1191 = vst [vmem:[%s2135_s23 + $0x28] sm:$0xff] %v1183_v55  ;;  %v1199_v63 = vmax.f32 %v1183_v55, 0.0  ;;  %v1209_v60 = vmul.f32 %v1201_v9, %v2198_v42 }
 0x1f1   : > { %v1213_v40 = vadd.f32 %v1212_v56, %v1206_v44  ;;  %v1207_v2 = vmul.f32 %v1199_v63, %v2197_v26  ;;  %v1217_v21 = vsel %vm1216_vm1, %v1209_v60, 0.0 }
 0x1f3   : > { %v1214_v16 = vadd.f32 %v1213_v40, %v1207_v2 }
 0x1f5   : > { %v1215_v5 = vadd.f32 %v1214_v16, %v1208_v52 }
 0x1f7   : > { %v1218_v1 = vadd.f32 %v1217_v21, %v1215_v5 }
 0x1f9   : > { %v1219_v4 = vrot.slane %v1218_v1, 4 }
 0x1fb   : > { %v1220_v27 = vadd.f32 %v1219_v4, %v1218_v1 }
 0x1fd   : > { %v1221_v0 = vrot.slane %v1220_v27, 2 }
 0x1ff   : > { %v1222_v8 = vadd.f32 %v1221_v0, %v1220_v27 }
 0x201   : > { %v1223_v54 = vrot.slane %v1222_v8, 1 }
 0x203   : > { %v1224_v13 = vadd.f32 %v1223_v54, %v1222_v8 }
 0x205   : > { %v1225_v17 = vmul.f32 0.020408163, %v1224_v13 }
 0x207   : > { %1605 = vmatmul.mubr.f32.vlgmr.msra.gmra.mxu1 %v1225_v17 }
 0x2c7   : > { %v1309_v33 = vpop.f32.mrf.mxu1 }
 0x2c8   : > { %v1310_v10 = vadd.f32 %v1309_v33, %v1242_v51 }
 0x2c9   : > { %v1606_v12 = vpop.f32.mrf.mxu1 }
 0x2ca   : > { %1313 = vst [vmem:[%s422_s28] sm:$0x1] %v1310_v10 }
 0x2cb PF: > { %s23_s21 = sadd.s32 1, %s1654_s21  }
 0x2cc   : > { %p20_p4 = scmp.ge.s32.totalorder %s23_s21, 4  }
 0x2ce   :  { %22 = sbr.rel (!%p20_p4) target bundleno = 1 (0x1), region = 106 }

</bundles_post_ra>
